<compile_context>
chip_gen: v6e
topology: v6e:2x2x1
jax: 0.10.0
libtpu: 0.0.40
codegen_flags: <defaults>
</compile_context>

<pallas_src>
import jax
import jax.numpy as jnp
from jax.experimental import pallas as pl
from jax.experimental.pallas import tpu as pltpu


def _round_up(x, m):
    return (x + m - 1) // m * m


def encoder_kernel(x_ref, w_ref, b_ref, o_ref):
    # Hot path: MXU matmul (f32 accumulate) + VPU bias add + ReLU.
    x = x_ref[...]                      # [TM, Dp]
    w = w_ref[...]                      # [Dp, TH]  (resident across M sweep)
    b = b_ref[...]                      # [1,  TH]  (f32)
    y = jnp.dot(x, w, preferred_element_type=jnp.float32) + b
    o_ref[...] = jnp.maximum(y, 0.0).astype(o_ref.dtype)


def g2t_forward(graph_feats, w, b, *, tm_max=512, th_max=512,
                compute_dtype=None):
    """graph_feats: [B, N, D] node features; returns encoded graph [B, N, H].

    compute_dtype: optionally jnp.bfloat16 for production shapes on v6e/v7x
    (halves x/w HBM traffic on a memory-bound op); bias/accum/ReLU stay f32.
    """
    B, N, D = graph_feats.shape
    H = w.shape[1]
    M = B * N

    # Lane-dense padding: feature dims to multiples of 128, rows to x8.
    Dp = _round_up(D, 128)
    Hp = _round_up(H, 128)
    TM = min(tm_max, _round_up(M, 8))
    Mp = _round_up(M, TM)
    TH = min(th_max, Hp)
    Hp = _round_up(Hp, TH)              # make Hp divisible by TH

    out_dtype = graph_feats.dtype
    xw_dtype = compute_dtype if compute_dtype is not None else graph_feats.dtype

    x2 = graph_feats.reshape(M, D)
    x_p = jnp.zeros((Mp, Dp), xw_dtype).at[:M, :D].set(x2.astype(xw_dtype))
    w_p = jnp.zeros((Dp, Hp), xw_dtype).at[:D, :H].set(w.astype(xw_dtype))
    b_p = jnp.zeros((1, Hp), jnp.float32).at[0, :H].set(b.astype(jnp.float32))

    n_m = Mp // TM
    n_h = Hp // TH
    itemsize = jnp.dtype(xw_dtype).itemsize

    cost = pl.CostEstimate(
        flops=2 * Mp * Dp * Hp,
        transcendentals=0,
        bytes_accessed=itemsize * (Mp * Dp + Dp * Hp)
        + jnp.dtype(out_dtype).itemsize * Mp * Hp,
    )

    out = pl.pallas_call(
        encoder_kernel,
        out_shape=jax.ShapeDtypeStruct((Mp, Hp), out_dtype),
        # Grid = (h_tiles, m_tiles): M is the inner/fast axis so the weight and
        # bias blocks (index_map independent of i) remain VMEM-resident across
        # the whole M sweep.
        grid=(n_h, n_m),
        in_specs=[
            pl.BlockSpec((TM, Dp), lambda j, i: (i, 0)),   # x tile
            pl.BlockSpec((Dp, TH), lambda j, i: (0, j)),   # w: resident over i
            pl.BlockSpec((1, TH), lambda j, i: (0, j)),    # b: resident over i
        ],
        out_specs=pl.BlockSpec((TM, TH), lambda j, i: (i, j)),
        compiler_params=pltpu.CompilerParams(
            dimension_semantics=("parallel", "parallel"),
        ),
        cost_estimate=cost,
    )(x_p, w_p, b_p)

    return out[:M, :H].reshape(B, N, H)


if __name__ == "__main__":
    # Small shapes consistent with a graph-encoder forward pass.
    # NOTE: at these toy sizes (~65 KFLOP) pallas_call launch overhead
    # dominates; the tiling above pays off at production B*N and D/H.
    B, N, D, H = 2, 8, 32, 32

    key = jax.random.PRNGKey(0)
    k_x, k_w, k_b = jax.random.split(key, 3)

    graph = jax.random.normal(k_x, (B, N, D), dtype=jnp.float32)
    # Deterministic encoder parameters (synthetic, not a checkpoint load).
    w_enc = jax.random.normal(k_w, (D, H), dtype=jnp.float32) * 0.05
    b_enc = jax.random.normal(k_b, (H,), dtype=jnp.float32) * 0.01

    out = g2t_forward(graph, w_enc, b_enc)
    out = jax.block_until_ready(out)

    # Reference check against plain-JAX forward.
    ref = jnp.maximum(jnp.einsum("bnd,dh->bnh", graph, w_enc) + b_enc, 0.0)
    assert out.shape == (B, N, H)
    assert jnp.allclose(out, ref, atol=1e-5, rtol=1e-5)

    print("KERNEL_OK")
</pallas_src>

<mosaic_0001>
module attributes {stable_mosaic.version = 11 : i64} {
  func.func @encoder_kernel(%arg0: i32, %arg1: i32, %arg2: memref<16x128xf32, #tpu.memory_space<vmem>>, %arg3: memref<128x128xf32, #tpu.memory_space<vmem>>, %arg4: memref<1x128xf32, #tpu.memory_space<vmem>>, %arg5: memref<16x128xf32, #tpu.memory_space<vmem>>) attributes {dimension_semantics = [#tpu.dimension_semantics<parallel>, #tpu.dimension_semantics<parallel>], iteration_bounds = array<i64: 1, 1>, scalar_prefetch = 0 : i64, scratch_operands = 0 : i64, tpu.core_type = #tpu.core_type<tc>, window_params = [{transform_indices = @transform_0, window_bounds = array<i64: 16, 128>}, {transform_indices = @transform_1, window_bounds = array<i64: 128, 128>}, {transform_indices = @transform_2, window_bounds = array<i64: 1, 128>}, {transform_indices = @transform_3, window_bounds = array<i64: 16, 128>}]} {
    %c0 = arith.constant 0 : index
    %c0_0 = arith.constant 0 : index
    %0 = vector.load %arg2[%c0, %c0_0] : memref<16x128xf32, #tpu.memory_space<vmem>>, vector<16x128xf32>
    %c0_1 = arith.constant 0 : index
    %c0_2 = arith.constant 0 : index
    %1 = vector.load %arg3[%c0_1, %c0_2] : memref<128x128xf32, #tpu.memory_space<vmem>>, vector<128x128xf32>
    %c0_3 = arith.constant 0 : index
    %c0_4 = arith.constant 0 : index
    %2 = vector.load %arg4[%c0_3, %c0_4] : memref<1x128xf32, #tpu.memory_space<vmem>>, vector<1x128xf32>
    %cst = arith.constant dense<0.000000e+00> : vector<16x128xf32>
    %3 = tpu.matmul %0, %1, %cst {dimension_numbers = #tpu.dot_dimension_numbers<[1], [0], [0], [1], [0, 0, 1, 1], [], []>} : vector<16x128xf32>, vector<128x128xf32>, vector<16x128xf32> -> vector<16x128xf32>
    %4 = vector.broadcast %2 : vector<1x128xf32> to vector<16x128xf32>
    %5 = arith.addf %3, %4 : vector<16x128xf32>
    %cst_5 = arith.constant 0.000000e+00 : f32
    %6 = vector.broadcast %cst_5 : f32 to vector<16x128xf32>
    %7 = arith.maximumf %5, %6 : vector<16x128xf32>
    %c0_6 = arith.constant 0 : index
    %c0_7 = arith.constant 0 : index
    %8 = vector.load %arg5[%c0_6, %c0_7] : memref<16x128xf32, #tpu.memory_space<vmem>>, vector<16x128xf32>
    tpu.vector_store %arg5[%c0_6, %c0_7], %7 {strides = array<i32>} : memref<16x128xf32, #tpu.memory_space<vmem>>, vector<16x128xf32>,
    return
  }
  func.func @transform_0(%arg0: i32, %arg1: i32) -> (i32, i32) {
    %c0_i32 = arith.constant 0 : i32
    %c0_i32_0 = arith.constant 0 : i32
    return %arg1, %c0_i32 : i32, i32
  }
  func.func @transform_1(%arg0: i32, %arg1: i32) -> (i32, i32) {
    %c0_i32 = arith.constant 0 : i32
    %c0_i32_0 = arith.constant 0 : i32
    return %c0_i32, %arg0 : i32, i32
  }
  func.func @transform_2(%arg0: i32, %arg1: i32) -> (i32, i32) {
    %c0_i32 = arith.constant 0 : i32
    %c0_i32_0 = arith.constant 0 : i32
    return %c0_i32, %arg0 : i32, i32
  }
  func.func @transform_3(%arg0: i32, %arg1: i32) -> (i32, i32) {
    %c0_i32 = arith.constant 0 : i32
    return %arg1, %arg0 : i32, i32
  }
}

</mosaic_0001>

<bundles_post_ra>
// kernel: tpu_custom_call.1
= control target key start
LH: loop header
LB: loop body
LE: loop exit
PB: predicated region body
PF: predicated region fallthrough
CT: control target
= control target key end

     0   :  { %8 = vsyncpa [#allocation3], 0  ;;  %s336_s0 = inlined_call_operand.hbm [shape: f32[16,128], index: 0, kind: input, shape index: {}]   ;;  %s337_s1 = inlined_call_operand.hbm [shape: f32[128,128], index: 1, kind: input, shape index: {}]   ;;  %s338_s2 = inlined_call_operand.vmem [shape: f32[1,128], index: 2, kind: input, shape index: {}]   ;;  %s339_s3 = inlined_call_operand.hbm [shape: f32[16,128], index: 3, kind: output, shape index: {}]  }
   0x1   :  { %9 = vsyncpa [#allocation6], 0 }
   0x2   :  { %10 = vsyncpa [#allocation4], 0  ;;  %s290_s12 = smov [#allocation2]  }
   0x3   :  { %s16_s13 = sshll.u32 %s290_s12, 4  ;;  %s17_s13 = int_to_ptr.vmem [resolvable:$true] %s16_s13 }
   0x4   :  { %s232_s14 = scalar_lea.vmem %s17_s13, 256  ;;  %p237_p1 = scmp.lt.s32.totalorder %s17_s13, %s17_s13 }
   0x5   :  { %p233_p0 = scmp.ne.s32.totalorder %s17_s13, %s232_s14  ;;  %p238_p2 = scmp.lt.s32.totalorder %s232_s14, %s232_s14 }
   0x7   :  { %p239_p3 = por %p238_p2, %p237_p1 }
   0x9   :  { %p240_p4 = pnand %p239_p3, %p233_p0 }
   0xb   :  { %243 = shalt.err (!%p240_p4)
}
   0xc   :  { %s291_s15 = smov 128   ;;  %s292_s16 = smov 8  }
   0xd   :  { %22 = dma.hbm_to_vmem [thread:$0]  %s336_s0, 256, %s17_s13, [#allocation3], %s291_s15, %s291_s15, %s292_s16  }
   0xe   :  { %s293_s19 = smov [#allocation5]  }
   0xf   :  { %s28_s20 = sshll.u32 %s293_s19, 4  ;;  %s29_s20 = int_to_ptr.vmem [resolvable:$true] %s28_s20 }
  0x10   :  { %s252_s21 = scalar_lea.vmem %s29_s20, 2048  ;;  %p257_p6 = scmp.lt.s32.totalorder %s29_s20, %s29_s20 }
  0x11   :  { %p253_p5 = scmp.ne.s32.totalorder %s29_s20, %s252_s21  ;;  %p258_p7 = scmp.lt.s32.totalorder %s252_s21, %s252_s21 }
  0x13   :  { %p259_p8 = por %p258_p7, %p257_p6 }
  0x15   :  { %p260_p9 = pnand %p259_p8, %p253_p5 }
  0x17   :  { %263 = shalt.err (!%p260_p9)
}
  0x18   :  { %34 = dma.hbm_to_vmem [thread:$0]  %s337_s1, 2048, %s29_s20, [#allocation6], %s291_s15, %s291_s15, %s292_s16  }
  0x19   :  { %284 = dma.done.wait [#allocation3], 256  }
  0x1a   :  { %285 = vsyncadd [#allocation3], 4294967040 }
  0x1b   :  { %286 = dma.done.wait [#allocation6], 2048  }
  0x1c   :  { %287 = vsyncadd [#allocation6], 4294965248  ;;  %v60_v0 = vld [vmem:[#allocation5 + $0x78] sm:$0xff]  ;;  %v59_v1 = vld [vmem:[#allocation5 + $0x70] sm:$0xff]  ;;  %s294_s24 = smov [#allocation7]  }
  0x1d   :  { %184 = vmatprep.subr.mxu0 %v60_v0  ;;  %v58_v2 = vld [vmem:[#allocation5 + $0x68] sm:$0xff]  ;;  %v57_v3 = vld [vmem:[#allocation5 + $0x60] sm:$0xff]  ;;  %v43_v4 = vld [vmem:[#allocation2] sm:$0xff]  ;;  %s152_s25 = sshll.u32 %s294_s24, 4  ;;  %s153_s25 = int_to_ptr.vmem [resolvable:$true] %s152_s25 }
  0x1e   :  { %185 = vmatpush3.msra.mxu0 %v60_v0  ;;  %v56_v5 = vld [vmem:[#allocation5 + $0x58] sm:$0xff]  ;;  %216 = vmatprep.mubr.f32.mxu0 %v43_v4  ;;  %v55_v6 = vld [vmem:[#allocation5 + $0x50] sm:$0xff]  ;;  %v54_v7 = vld [vmem:[#allocation5 + $0x48] sm:$0xff]  ;;  %s264_s26 = scalar_lea.vmem %s153_s25, 256  ;;  %p269_p11 = scmp.lt.s32.totalorder %s153_s25, %s153_s25 }
  0x1f   :  { %186 = vmatprep.subr.mxu0 %v59_v1  ;;  %v53_v8 = vld [vmem:[#allocation5 + $0x40] sm:$0xff]  ;;  %v52_v9 = vld [vmem:[#allocation5 + $0x38] sm:$0xff]  ;;  %v51_v10 = vld [vmem:[#allocation5 + $0x30] sm:$0xff]  ;;  %p265_p10 = scmp.ne.s32.totalorder %s153_s25, %s264_s26  ;;  %p270_p12 = scmp.lt.s32.totalorder %s264_s26, %s264_s26 }
  0x20   :  { %187 = vmatpush3.msra.mxu0 %v59_v1  ;;  %v50_v11 = vld [vmem:[#allocation5 + $0x28] sm:$0xff]  ;;  %v49_v12 = vld [vmem:[#allocation5 + $0x20] sm:$0xff]  ;;  %v48_v13 = vld [vmem:[#allocation5 + $0x18] sm:$0xff] }
  0x21   :  { %188 = vmatprep.subr.mxu0 %v58_v2  ;;  %v47_v14 = vld [vmem:[#allocation5 + $0x10] sm:$0xff]  ;;  %v46_v15 = vld [vmem:[#allocation5 + $0x8] sm:$0xff]  ;;  %v45_v16 = vld [vmem:[#allocation5] sm:$0xff]  ;;  %p271_p13 = por %p270_p12, %p269_p11 }
  0x22   :  { %189 = vmatpush3.msra.mxu0 %v58_v2  ;;  %v44_v17 = vld [vmem:[#allocation2 + $0x8] sm:$0xff]  ;;  %v165_v18 = vld [vmem:[%s338_s2] ss:$0 sm:$0xff] }
  0x23   :  { %190 = vmatprep.subr.mxu0 %v57_v3  ;;  %p272_p0 = pnand %p271_p13, %p265_p10 }
  0x24   :  { %191 = vmatpush3.msra.mxu0 %v57_v3 }
  0x25   :  { %192 = vmatprep.subr.mxu0 %v56_v5 }
  0x26   :  { %193 = vmatpush3.msra.mxu0 %v56_v5 }
  0x27   :  { %194 = vmatprep.subr.mxu0 %v55_v6 }
  0x28   :  { %195 = vmatpush3.msra.mxu0 %v55_v6 }
  0x29   :  { %196 = vmatprep.subr.mxu0 %v54_v7 }
  0x2a   :  { %197 = vmatpush3.msra.mxu0 %v54_v7 }
  0x2b   :  { %198 = vmatprep.subr.mxu0 %v53_v8 }
  0x2c   :  { %199 = vmatpush3.msra.mxu0 %v53_v8 }
  0x2d   :  { %200 = vmatprep.subr.mxu0 %v52_v9 }
  0x2e   :  { %201 = vmatpush3.msra.mxu0 %v52_v9 }
  0x2f   :  { %202 = vmatprep.subr.mxu0 %v51_v10 }
  0x30   :  { %203 = vmatpush3.msra.mxu0 %v51_v10 }
  0x31   :  { %204 = vmatprep.subr.mxu0 %v50_v11 }
  0x32   :  { %205 = vmatpush3.msra.mxu0 %v50_v11 }
  0x33   :  { %206 = vmatprep.subr.mxu0 %v49_v12 }
  0x34   :  { %207 = vmatpush3.msra.mxu0 %v49_v12 }
  0x35   :  { %208 = vmatprep.subr.mxu0 %v48_v13 }
  0x36   :  { %209 = vmatpush3.msra.mxu0 %v48_v13 }
  0x37   :  { %210 = vmatprep.subr.mxu0 %v47_v14 }
  0x38   :  { %211 = vmatpush3.msra.mxu0 %v47_v14 }
  0x39   :  { %212 = vmatprep.subr.mxu0 %v46_v15 }
  0x3a   :  { %213 = vmatpush3.msra.mxu0 %v46_v15 }
  0x3b   :  { %214 = vmatprep.subr.mxu0 %v45_v16 }
  0x3c   :  { %215 = vmatpush3.msra.mxu0 %v45_v16 }
  0x3d   :  { %217 = vmatmul.mubr.f32.vlgmr.msra.gmra.mxu0 %v44_v17 }
  0xfd   :  { %v218_v19 = vpop.f32.mrf.mxu0 }
  0xfe   :  { %v140_v20 = vadd.f32 %v218_v19, %v165_v18 }
  0xff   :  { %v134_v21 = vpop.f32.mrf.mxu0 }
 0x100   :  { %v144_v22 = vmax.f32 %v140_v20, 0.0  ;;  %v135_v23 = vadd.f32 %v165_v18, %v134_v21 }
 0x102   :  { %146 = vst [vmem:[#allocation7 + $0x8] sm:$0xff] %v144_v22  ;;  %v143_v24 = vmax.f32 %v135_v23, 0.0 }
 0x104   :  { %145 = vst [vmem:[#allocation7] sm:$0xff] %v143_v24 }
 0x105   :  { %275 = shalt.err (!%p272_p0)
}
 0x106   :  { %158 = dma.vmem_to_hbm [thread:$0]  %s153_s25, 256, %s339_s3, [#allocation4], %s291_s15, %s291_s15, %s292_s16  }
 0x107   :  { %288 = dma.done.wait [#allocation4], 256  }
 0x108   :  { %289 = vsyncadd [#allocation4], 4294967040 }
 0x109   :  { %162 = vsyncpa [#allocation3], 1 }
 0x10a   :  { %163 = vsyncpa [#allocation6], 1 }
 0x10b   :  { %164 = vsyncpa [#allocation4], 1 }

</bundles_post_ra>
